<compile_context>
chip_gen: v7x
topology: tpu7x:2x2x1
jax: 0.10.0
libtpu: 0.0.40
codegen_flags: <defaults>
</compile_context>

<pallas_src>
import jax
import jax.numpy as jnp
from jax.experimental import pallas as pl
from jax.experimental.pallas import tpu as pltpu


def linear_kernel(w_ref, b_ref, xt_ref, o_ref):
    # w_ref: (K,) f32 in SMEM, b_ref: (1,) f32 in SMEM,
    # xt_ref: (K, TB) f32 in VMEM (batch on lanes), o_ref: (1, TB) in VMEM.
    x = xt_ref[...].astype(jnp.float32)            # (K, TB)
    K, TB = x.shape
    acc = jnp.full((1, TB), b_ref[0], dtype=jnp.float32)
    # K (=10) scalar x vreg FMAs on the VPU; static unroll, MXU intentionally unused.
    for k in range(K):
        acc = acc + w_ref[k] * x[k:k + 1, :]
    o_ref[...] = acc.astype(o_ref.dtype)           # lane-dense (1, TB) store


def simple_model_forward(x, weight, bias, *, batch_tile=4096):
    """x: (B, 10) f32; weight: (1, 10) f32 (torch nn.Linear layout); bias: (1,) f32
    -> (B, 1) f32."""
    B, K = x.shape
    assert weight.shape == (1, K)
    w = weight.reshape(K).astype(jnp.float32)      # (K,) scalars -> SMEM
    b = bias.reshape(1).astype(jnp.float32)        # (1,) scalar  -> SMEM
    xt = jnp.transpose(x)                          # (K, B): batch on lanes

    if B <= batch_tile:
        # Tiny/moderate B: single invocation, no grid, whole-array blocks.
        # (At B~8 this is launch-overhead dominated; kept minimal on purpose.)
        yt = pl.pallas_call(
            linear_kernel,
            out_shape=jax.ShapeDtypeStruct((1, B), jnp.float32),
            in_specs=[
                pl.BlockSpec(memory_space=pltpu.MemorySpace.SMEM),   # weights
                pl.BlockSpec(memory_space=pltpu.MemorySpace.SMEM),   # bias
                pl.BlockSpec(memory_space=pltpu.MemorySpace.VMEM),   # x^T (K, B)
            ],
            out_specs=pl.BlockSpec(memory_space=pltpu.MemorySpace.VMEM),
        )(w, b, xt)
        return yt.reshape(B, 1)

    # Large B: tile the batch along lanes.  grid >= 2 steps here by construction,
    # so "parallel" can shard across v7x's two TensorCores (no-op on v5e/v6e).
    n_tiles = pl.cdiv(B, batch_tile)
    Bp = n_tiles * batch_tile
    if Bp != B:
        # Pad the ragged tail; padded lanes compute y = b and are sliced off below.
        xt = jnp.pad(xt, ((0, 0), (0, Bp - B)))

    yt = pl.pallas_call(
        linear_kernel,
        out_shape=jax.ShapeDtypeStruct((n_tiles, batch_tile), jnp.float32),
        grid=(n_tiles,),
        in_specs=[
            pl.BlockSpec(memory_space=pltpu.MemorySpace.SMEM),       # weights (whole)
            pl.BlockSpec(memory_space=pltpu.MemorySpace.SMEM),       # bias (whole)
            pl.BlockSpec((K, batch_tile), lambda i: (0, i)),         # x^T tile
        ],
        out_specs=pl.BlockSpec((1, batch_tile), lambda i: (i, 0)),   # lane-dense row
        compiler_params=pltpu.CompilerParams(
            dimension_semantics=("parallel",),
        ),
    )(w, b, xt)
    # Row i holds outputs for batch rows [i*batch_tile, (i+1)*batch_tile).
    return yt.reshape(-1)[:B].reshape(B, 1)


if __name__ == "__main__":
    key = jax.random.PRNGKey(0)
    kx, kw, kb, kx2 = jax.random.split(key, 4)

    IN, OUT = 10, 1

    # Deterministic parameter init mimicking torch.nn.Linear default:
    # uniform(-1/sqrt(in_features), 1/sqrt(in_features))
    bound = 1.0 / jnp.sqrt(jnp.float32(IN))
    weight = jax.random.uniform(kw, (OUT, IN), jnp.float32, -bound, bound)
    bias = jax.random.uniform(kb, (OUT,), jnp.float32, -bound, bound)

    # 1) Tiny-batch path (no grid), matching the module's typical use.
    B1 = 8
    x1 = jax.random.normal(kx, (B1, IN), jnp.float32)
    out1 = jax.block_until_ready(simple_model_forward(x1, weight, bias))
    ref1 = x1 @ weight.T + bias
    assert out1.shape == (B1, OUT)
    assert jnp.allclose(out1, ref1, atol=1e-5, rtol=1e-5)

    # 2) Gridded lane-dense path, exercised at a small shape (batch_tile=128,
    #    ragged last tile) to verify the production large-B code path.
    B2 = 300
    x2 = jax.random.normal(kx2, (B2, IN), jnp.float32)
    out2 = jax.block_until_ready(
        simple_model_forward(x2, weight, bias, batch_tile=128))
    ref2 = x2 @ weight.T + bias
    assert out2.shape == (B2, OUT)
    assert jnp.allclose(out2, ref2, atol=1e-5, rtol=1e-5)

    print("KERNEL_OK")
</pallas_src>

<mosaic_0001>
module attributes {stable_mosaic.version = 11 : i64} {
  func.func @linear_kernel(%arg0: memref<10xf32, #tpu.memory_space<smem>>, %arg1: memref<1xf32, #tpu.memory_space<smem>>, %arg2: memref<10x8xf32, #tpu.memory_space<vmem>>, %arg3: memref<1x8xf32, #tpu.memory_space<vmem>>) attributes {dimension_semantics = [], scalar_prefetch = 0 : i64, scratch_operands = 0 : i64, tpu.core_type = #tpu.core_type<tc>} {
    %c0 = arith.constant 0 : index
    %c0_0 = arith.constant 0 : index
    %0 = vector.load %arg2[%c0, %c0_0] : memref<10x8xf32, #tpu.memory_space<vmem>>, vector<10x8xf32>
    %c0_1 = arith.constant 0 : index
    %1 = memref.load %arg1[%c0_1] : memref<1xf32, #tpu.memory_space<smem>>
    %2 = vector.broadcast %1 : f32 to vector<1x8xf32>
    %c0_2 = arith.constant 0 : index
    %3 = memref.load %arg0[%c0_2] : memref<10xf32, #tpu.memory_space<smem>>
    %4 = vector.extract_strided_slice %0 {offsets = [0, 0], sizes = [1, 8], strides = [1, 1]} : vector<10x8xf32> to vector<1x8xf32>
    %5 = vector.broadcast %3 : f32 to vector<1x8xf32>
    %6 = arith.mulf %5, %4 : vector<1x8xf32>
    %7 = arith.addf %2, %6 : vector<1x8xf32>
    %c1 = arith.constant 1 : index
    %8 = memref.load %arg0[%c1] : memref<10xf32, #tpu.memory_space<smem>>
    %9 = vector.extract_strided_slice %0 {offsets = [1, 0], sizes = [1, 8], strides = [1, 1]} : vector<10x8xf32> to vector<1x8xf32>
    %10 = vector.broadcast %8 : f32 to vector<1x8xf32>
    %11 = arith.mulf %10, %9 : vector<1x8xf32>
    %12 = arith.addf %7, %11 : vector<1x8xf32>
    %c2 = arith.constant 2 : index
    %13 = memref.load %arg0[%c2] : memref<10xf32, #tpu.memory_space<smem>>
    %14 = vector.extract_strided_slice %0 {offsets = [2, 0], sizes = [1, 8], strides = [1, 1]} : vector<10x8xf32> to vector<1x8xf32>
    %15 = vector.broadcast %13 : f32 to vector<1x8xf32>
    %16 = arith.mulf %15, %14 : vector<1x8xf32>
    %17 = arith.addf %12, %16 : vector<1x8xf32>
    %c3 = arith.constant 3 : index
    %18 = memref.load %arg0[%c3] : memref<10xf32, #tpu.memory_space<smem>>
    %19 = vector.extract_strided_slice %0 {offsets = [3, 0], sizes = [1, 8], strides = [1, 1]} : vector<10x8xf32> to vector<1x8xf32>
    %20 = vector.broadcast %18 : f32 to vector<1x8xf32>
    %21 = arith.mulf %20, %19 : vector<1x8xf32>
    %22 = arith.addf %17, %21 : vector<1x8xf32>
    %c4 = arith.constant 4 : index
    %23 = memref.load %arg0[%c4] : memref<10xf32, #tpu.memory_space<smem>>
    %24 = vector.extract_strided_slice %0 {offsets = [4, 0], sizes = [1, 8], strides = [1, 1]} : vector<10x8xf32> to vector<1x8xf32>
    %25 = vector.broadcast %23 : f32 to vector<1x8xf32>
    %26 = arith.mulf %25, %24 : vector<1x8xf32>
    %27 = arith.addf %22, %26 : vector<1x8xf32>
    %c5 = arith.constant 5 : index
    %28 = memref.load %arg0[%c5] : memref<10xf32, #tpu.memory_space<smem>>
    %29 = vector.extract_strided_slice %0 {offsets = [5, 0], sizes = [1, 8], strides = [1, 1]} : vector<10x8xf32> to vector<1x8xf32>
    %30 = vector.broadcast %28 : f32 to vector<1x8xf32>
    %31 = arith.mulf %30, %29 : vector<1x8xf32>
    %32 = arith.addf %27, %31 : vector<1x8xf32>
    %c6 = arith.constant 6 : index
    %33 = memref.load %arg0[%c6] : memref<10xf32, #tpu.memory_space<smem>>
    %34 = vector.extract_strided_slice %0 {offsets = [6, 0], sizes = [1, 8], strides = [1, 1]} : vector<10x8xf32> to vector<1x8xf32>
    %35 = vector.broadcast %33 : f32 to vector<1x8xf32>
    %36 = arith.mulf %35, %34 : vector<1x8xf32>
    %37 = arith.addf %32, %36 : vector<1x8xf32>
    %c7 = arith.constant 7 : index
    %38 = memref.load %arg0[%c7] : memref<10xf32, #tpu.memory_space<smem>>
    %39 = vector.extract_strided_slice %0 {offsets = [7, 0], sizes = [1, 8], strides = [1, 1]} : vector<10x8xf32> to vector<1x8xf32>
    %40 = vector.broadcast %38 : f32 to vector<1x8xf32>
    %41 = arith.mulf %40, %39 : vector<1x8xf32>
    %42 = arith.addf %37, %41 : vector<1x8xf32>
    %c8 = arith.constant 8 : index
    %43 = memref.load %arg0[%c8] : memref<10xf32, #tpu.memory_space<smem>>
    %44 = vector.extract_strided_slice %0 {offsets = [8, 0], sizes = [1, 8], strides = [1, 1]} : vector<10x8xf32> to vector<1x8xf32>
    %45 = vector.broadcast %43 : f32 to vector<1x8xf32>
    %46 = arith.mulf %45, %44 : vector<1x8xf32>
    %47 = arith.addf %42, %46 : vector<1x8xf32>
    %c9 = arith.constant 9 : index
    %48 = memref.load %arg0[%c9] : memref<10xf32, #tpu.memory_space<smem>>
    %49 = vector.extract_strided_slice %0 {offsets = [9, 0], sizes = [1, 8], strides = [1, 1]} : vector<10x8xf32> to vector<1x8xf32>
    %50 = vector.broadcast %48 : f32 to vector<1x8xf32>
    %51 = arith.mulf %50, %49 : vector<1x8xf32>
    %52 = arith.addf %47, %51 : vector<1x8xf32>
    %c0_3 = arith.constant 0 : index
    %c0_4 = arith.constant 0 : index
    %53 = vector.load %arg3[%c0_3, %c0_4] : memref<1x8xf32, #tpu.memory_space<vmem>>, vector<1x8xf32>
    tpu.vector_store %arg3[%c0_3, %c0_4], %52 {strides = array<i32>} : memref<1x8xf32, #tpu.memory_space<vmem>>, vector<1x8xf32>,
    return
  }
}

</mosaic_0001>

<bundles_post_ra>
// kernel: tpu_custom_call.1
= control target key start
LH: loop header
LB: loop body
LE: loop exit
PB: predicated region body
PF: predicated region fallthrough
CT: control target
= control target key end

     0   :  { %9 = vsyncpa [#allocation5], 0  ;;  %s209_s0 = inlined_call_operand.vmem [shape: f32[10], index: 0, kind: input, shape index: {}]   ;;  %s210_s1 = inlined_call_operand.<no memory space> [shape: f32[1], index: 1, kind: input, shape index: {}]   ;;  %s211_s2 = inlined_call_operand.vmem [shape: f32[10,8], index: 2, kind: input, shape index: {}]   ;;  %s212_s3 = inlined_call_operand.hbm [shape: f32[1,8], index: 3, kind: output, shape index: {}]  }
   0x1   :  { %10 = vsyncpa [#allocation4], 0  ;;  %s17_s14 = sshll.u32 %s209_s0, 4  ;;  %s18_s14 = int_to_ptr.vmem [resolvable:$true] %s17_s14 }
   0x2   :  { %s125_s15 = scalar_lea.vmem %s18_s14, 16  ;;  %p130_p1 = scmp.lt.s32.totalorder %s18_s14, %s18_s14 }
   0x3   :  { %p126_p0 = scmp.ne.s32.totalorder %s18_s14, %s125_s15  ;;  %p131_p2 = scmp.lt.s32.totalorder %s125_s15, %s125_s15 }
   0x5   :  { %p132_p3 = por %p131_p2, %p130_p1 }
   0x7   :  { %p133_p4 = pnand %p132_p3, %p126_p0 }
   0x9   :  { %136 = shalt.err (!%p133_p4)
}
   0xa   :  { %s163_s16 = smov [#allocation3]  }
   0xb   :  { %20 = dma.vmem_to_smem %s18_s14, 16, %s163_s16, [#allocation5]  }
   0xc   :  { %159 = dma.done.wait [#allocation5], 16  }
   0xd   :  { %160 = vsyncadd [#allocation5], 4294967280 }
   0xe   :  { %28 = sfence }
   0xf   :  { %s33_s17 = sld [smem:[#allocation3]]  ;;  %s114_s18 = sld [smem:[#allocation3 + $0x1]]  ;;  %v29_v0 = vld [vmem:[%s211_s2] sm:$0xff]  ;;  %v32_v1 = vstv %s210_s1  ;;  %v30_v27 = vld [vmem:[%s211_s2 + $0x8] sm:$0x3]  ;;  %vm97_vm0 = vcmask 57344  }
  0x10   :  { %s115_s19 = sld [smem:[#allocation3 + $0x2]]  ;;  %s116_s20 = sld [smem:[#allocation3 + $0x3]] }
  0x11   :  { %s117_s21 = sld [smem:[#allocation3 + $0x4]]  ;;  %s118_s22 = sld [smem:[#allocation3 + $0x5]] }
  0x12   :  { %s119_s0 = sld [smem:[#allocation3 + $0x6]]  ;;  %s120_s25 = sld [smem:[#allocation3 + $0x7]] }
  0x13   :  { %s122_s28 = sld [smem:[#allocation3 + $0x9]]  ;;  %s121_s29 = sld [smem:[#allocation3 + $0x8]] }
  0x14   :  { %s164_s4 = smov [#allocation6]  }
  0x15   :  { %v34_v2 = vstv %s33_s17  ;;  %v38_v4 = vstv %s114_s18  ;;  %s105_s5 = sshll.u32 %s164_s4, 4  ;;  %s106_s5 = int_to_ptr.vmem [resolvable:$true] %s105_s5 }
  0x16   :  { %v35_v3 = vmul.f32 %v34_v2, %v29_v0  ;;  %v45_v5 = vstv %s115_s19  ;;  %v39_v6 = vmul.f32 %v38_v4, %v29_v0  ;;  %v52_v8 = vstv %s116_s20  ;;  %s137_s6 = scalar_lea.vmem %s106_s5, 16  ;;  %s141_s2 = scalar_lea.vmem %s106_s5, 32 }
  0x17   :  { %v46_v7 = vmul.f32 %v45_v5, %v29_v0  ;;  %v59_v9 = vstv %s117_s21  ;;  %v53_v11 = vmul.f32 %v52_v8, %v29_v0  ;;  %v66_v12 = vstv %s118_s22  ;;  %p138_p5 = scmp.ne.s32.totalorder %s106_s5, %s137_s6  ;;  %p142_p6 = scmp.lt.s32.totalorder %s106_s5, %s106_s5 }
  0x18   :  { %v36_v10 = vadd.f32 %v35_v3, %v32_v1  ;;  %v41_v13 = vrot.slane %v39_v6, 1  ;;  %v60_v15 = vmul.f32 %v59_v9, %v29_v0  ;;  %v73_v16 = vstv %s119_s0  ;;  %p143_p7 = scmp.lt.s32.totalorder %s141_s2, %s137_s6 }
  0x19   :  { %v48_v14 = vrot.slane %v46_v7, 2  ;;  %v55_v18 = vrot.slane %v53_v11, 3  ;;  %v67_v19 = vmul.f32 %v66_v12, %v29_v0  ;;  %v80_v20 = vstv %s120_s25 }
  0x1a   :  { %v43_v17 = vadd.f32 %v41_v13, %v36_v10  ;;  %v62_v22 = vrot.slane %v60_v15, 4  ;;  %v74_v23 = vmul.f32 %v73_v16, %v29_v0  ;;  %v81_v26 = vmul.f32 %v80_v20, %v29_v0  ;;  %p144_p8 = por %p143_p7, %p142_p6 }
  0x1b   :  { %v69_v25 = vrot.slane %v67_v19, 5  ;;  %v91_v28 = vstv %s122_s28  ;;  %v87_v31 = vstv %s121_s29 }
  0x1c   :  { %v50_v21 = vadd.f32 %v48_v14, %v43_v17  ;;  %v76_v30 = vrot.slane %v74_v23, 6  ;;  %v83_v33 = vrot.slane %v81_v26, 7  ;;  %v92_v34 = vmul.f32 %v91_v28, %v30_v27  ;;  %p145_p9 = pnand %p144_p8, %p138_p5 }
  0x1d   :  { %v88_v36 = vmul.f32 %v87_v31, %v30_v27 }
  0x1e   :  { %v57_v24 = vadd.f32 %v55_v18, %v50_v21  ;;  %v94_v38 = vrot.slane %v92_v34, 1 }
  0x20   :  { %v64_v29 = vadd.f32 %v62_v22, %v57_v24 }
  0x22   :  { %v71_v32 = vadd.f32 %v69_v25, %v64_v29 }
  0x24   :  { %v78_v35 = vadd.f32 %v76_v30, %v71_v32 }
  0x26   :  { %v85_v37 = vadd.f32 %v83_v33, %v78_v35 }
  0x28   :  { %v89_v39 = vadd.f32 %v88_v36, %v85_v37 }
  0x2a   :  { %v96_v40 = vadd.f32 %v94_v38, %v89_v39 }
  0x2c   :  { %98 = vst.msk [vmem:[#allocation6] sm:$0x1] %vm97_vm0, %v96_v40 }
  0x2d   :  { %148 = shalt.err (!%p145_p9)
}
  0x2e   :  { %s149_s9 = scalar_lea.hbm %s212_s3, 16 }
  0x2f   :  { %p150_p10 = scmp.ne.s32.totalorder %s212_s3, %s149_s9  ;;  %p153_p11 = scmp.lt.u32.totalorder %s149_s9, %s212_s3 }
  0x31   :  { %p155_p12 = pnand %p153_p11, %p150_p10 }
  0x33   :  { %158 = shalt.err (!%p155_p12)
}
  0x34   :  { %108 = dma.vmem_to_hbm [thread:$0]  %s106_s5, 16, %s212_s3, [#allocation4]  }
  0x35   :  { %161 = dma.done.wait [#allocation4], 16  }
  0x36   :  { %162 = vsyncadd [#allocation4], 4294967280 }
  0x37   :  { %112 = vsyncpa [#allocation4], 1 }
  0x38   :  { %113 = vsyncpa [#allocation5], 1 }

</bundles_post_ra>
